<compile_context>
chip_gen: v6e
topology: v6e:2x2x1
jax: 0.10.0
libtpu: 0.0.40
codegen_flags: <defaults>
</compile_context>

<pallas_src>
import functools

import jax
import jax.numpy as jnp
from jax.experimental import pallas as pl
from jax.experimental.pallas import tpu as pltpu


def _upsample_block_kernel(xm_ref, xh_ref, w_ref, b_ref, o_ref, *, TH, W, Cin, Cout):
    # xm_ref: (1, TH, W+1, Cin)   input row tile (right edge already zero-padded)
    # xh_ref: (1, 1,  W+1, Cin)   one-row bottom halo for this tile
    # w_ref : (4, Cin, 4*Cout)    fused weights, index 2*dr+dc over the 2x2 neighbourhood;
    #                             columns hold all four output parities (folded 1x1 conv)
    # b_ref : (1, 4*Cout)         fused bias, tiled over the 4 output parities
    # o_ref : (1, TH, W, 4*Cout)  2x2 output block per input pixel (pixel-shuffle in wrapper)
    window = jnp.concatenate([xm_ref[0], xh_ref[0]], axis=0)          # (TH+1, W+1, Cin)
    acc = jnp.zeros((TH * W, 4 * Cout), jnp.float32)
    for dr in (0, 1):
        for dc in (0, 1):
            patch = window[dr:dr + TH, dc:dc + W, :].reshape(TH * W, Cin)
            acc = acc + jnp.dot(patch, w_ref[2 * dr + dc],
                                preferred_element_type=jnp.float32)
    y = acc + b_ref[...]
    o_ref[...] = y.reshape(1, TH, W, 4 * Cout).astype(o_ref.dtype)


def _build_fused_weights(wt, bt, wc, bc):
    """Fold ConvTranspose2d(k=3,s=2,p=1,op=1) + Conv2d(1x1) into subpixel weights.

    Returns:
      W_all: (4, Cin, 4*Cout)  -- [2*dr+dc] maps the input pixel at offset (dr, dc)
                                  to all four output parities (2*dh+dw blocks of Cout).
      b_all: (1, 4*Cout)
    """
    Cin = wt.shape[0]
    Cout = wc.shape[0]
    # Flipped deconv weight as an ordinary conv weight, layout (kh, kw, ci, co).
    wt_k = jnp.transpose(wt[:, :, ::-1, ::-1], (2, 3, 0, 1))          # (3, 3, Cin, Cin)
    wc_k = jnp.transpose(wc[:, :, 0, 0], (1, 0))                      # (Cin, Cout)
    w_f = jnp.einsum("hwic,co->hwio", wt_k, wc_k)                     # (3, 3, Cin, Cout)
    b_f = bt @ wc_k + bc                                              # (Cout,)

    W_all = jnp.zeros((4, Cin, 4 * Cout), jnp.float32)
    for dr in (0, 1):
        for dc in (0, 1):
            n = 2 * dr + dc
            for dh in (0, 1):
                for dw in (0, 1):
                    # neighbour (dr, dc) contributes to parity (dh, dw) iff dr<=dh, dc<=dw
                    if dr <= dh and dc <= dw:
                        p = 2 * dh + dw
                        kh = 1 if dh == 0 else (0 if dr == 0 else 2)
                        kw = 1 if dw == 0 else (0 if dc == 0 else 2)
                        W_all = W_all.at[n, :, p * Cout:(p + 1) * Cout].set(w_f[kh, kw])
    b_all = jnp.tile(b_f, 4).reshape(1, 4 * Cout)
    return W_all, b_all


def _pick_row_tile(H, W, Cin, Cout, budget_bytes=8 << 20, max_rows=512):
    """Largest divisor of H (<= max_rows) whose double-buffered blocks + in-kernel
    temporaries fit a conservative VMEM budget (safe on v5e/v6e/v7x)."""
    best = 1
    for th in range(1, min(H, max_rows) + 1):
        if H % th:
            continue
        per_step = (2 * th * (W + 1) * Cin          # double-buffered input block
                    + 2 * 1 * (W + 1) * Cin         # double-buffered halo block
                    + 2 * th * W * 4 * Cout         # double-buffered output block
                    + (th + 1) * (W + 1) * Cin      # in-kernel window copy
                    + 2 * th * W * 4 * Cout         # accumulator + store temp
                    + th * W * Cin) * 4             # one live patch
        if per_step <= budget_bytes:
            best = th
    return best


def upsample_block_forward(x_nchw, params, scale_factor=2, mode="bilinear"):
    """params = (wt, bt, wc, bc) in PyTorch layouts:
       wt: (Cin, Cin, 3, 3)  ConvTranspose2d.weight
       bt: (Cin,)            ConvTranspose2d.bias
       wc: (Cout, Cin, 1, 1) Conv2d.weight
       bc: (Cout,)           Conv2d.bias
    """
    assert scale_factor == 2, "only the ConvTranspose2d (scale_factor == 2) path is implemented"
    wt, bt, wc, bc = params
    N, Cin, H, W = x_nchw.shape
    Cout = wc.shape[0]

    # NHWC with a 1-pixel zero halo on the right/bottom (replaces the dilated tensor).
    xp = jnp.transpose(x_nchw, (0, 2, 3, 1)).astype(jnp.float32)      # (N, H, W, Cin)
    xp = jnp.pad(xp, ((0, 0), (0, 1), (0, 1), (0, 0)))                # (N, H+1, W+1, Cin)

    W_all, b_all = _build_fused_weights(wt, bt, wc, bc)

    TH = _pick_row_tile(H, W, Cin, Cout)
    grid = (N, H // TH)

    kern = functools.partial(_upsample_block_kernel, TH=TH, W=W, Cin=Cin, Cout=Cout)

    flops = 2 * N * H * W * (4 * Cin) * (4 * Cout)
    bytes_accessed = 4 * (N * (H + 1) * (W + 1) * Cin
                          + N * H * W * 4 * Cout
                          + 4 * Cin * 4 * Cout + 4 * Cout)

    yk = pl.pallas_call(
        kern,
        out_shape=jax.ShapeDtypeStruct((N, H, W, 4 * Cout), jnp.float32),
        grid_spec=pltpu.PrefetchScalarGridSpec(
            num_scalar_prefetch=0,
            grid=grid,
            in_specs=[
                # main row tile
                pl.BlockSpec((1, TH, W + 1, Cin), lambda n, i: (n, i, 0, 0)),
                # one-row bottom halo (same array, element-row (i+1)*TH via size-1 blocks)
                pl.BlockSpec((1, 1, W + 1, Cin), lambda n, i: (n, (i + 1) * TH, 0, 0)),
                pl.BlockSpec((4, Cin, 4 * Cout), lambda n, i: (0, 0, 0)),
                pl.BlockSpec((1, 4 * Cout), lambda n, i: (0, 0)),
            ],
            out_specs=pl.BlockSpec((1, TH, W, 4 * Cout), lambda n, i: (n, i, 0, 0)),
        ),
        compiler_params=pltpu.CompilerParams(
            dimension_semantics=("parallel", "parallel"),
            vmem_limit_bytes=48 * 1024 * 1024,
        ),
        cost_estimate=pl.CostEstimate(flops=flops, transcendentals=0,
                                      bytes_accessed=bytes_accessed),
    )(xp, xp, W_all, b_all)

    # Pixel-shuffle the 4 parities back to (N, Cout, 2H, 2W) in NCHW.
    y = yk.reshape(N, H, W, 2, 2, Cout)            # (n, r, c, dh, dw, o)
    y = jnp.transpose(y, (0, 5, 1, 3, 2, 4))       # (n, o, r, dh, c, dw)
    return y.reshape(N, Cout, 2 * H, 2 * W)


def _reference(x, wt, bt, wc, bc):
    """Pure-JAX reference (direct scatter form of ConvTranspose2d, then 1x1 conv)."""
    N, C, H, W = x.shape
    full = jnp.zeros((N, C, 2 * H + 1, 2 * W + 1), jnp.float32)
    for kh in range(3):
        for kw in range(3):
            contrib = jnp.einsum("ncij,co->noij", x, wt[:, :, kh, kw])
            full = full.at[:, :, kh:kh + 2 * H - 1:2, kw:kw + 2 * W - 1:2].add(contrib)
    y = full[:, :, 1:1 + 2 * H, 1:1 + 2 * W] + bt[None, :, None, None]
    out = jnp.einsum("nchw,oc->nohw", y, wc[:, :, 0, 0]) + bc[None, :, None, None]
    return out


if __name__ == "__main__":
    N, Cin, H, W = 2, 4, 16, 16
    Cout = 3

    key = jax.random.PRNGKey(0)
    k1, k2, k3, k4, k5 = jax.random.split(key, 5)
    x = jax.random.normal(k1, (N, Cin, H, W), jnp.float32)
    # deterministic synthetic parameters (shapes from the module __init__)
    wt = jax.random.normal(k2, (Cin, Cin, 3, 3), jnp.float32) * 0.1   # upsample2x.weight
    bt = jax.random.normal(k3, (Cin,), jnp.float32) * 0.1             # upsample2x.bias
    wc = jax.random.normal(k4, (Cout, Cin, 1, 1), jnp.float32) * 0.1  # conv.weight
    bc = jax.random.normal(k5, (Cout,), jnp.float32) * 0.1            # conv.bias

    out = upsample_block_forward(x, (wt, bt, wc, bc))
    out = jax.block_until_ready(out)

    assert out.shape == (N, Cout, 2 * H, 2 * W), out.shape
    ref = _reference(x, wt, bt, wc, bc)
    assert jnp.allclose(out, ref, atol=1e-4, rtol=1e-4), \
        float(jnp.max(jnp.abs(out - ref)))

    print("KERNEL_OK")
</pallas_src>

<mosaic_0001>
module attributes {stable_mosaic.version = 11 : i64} {
  func.func @_upsample_block_kernel(%arg0: i32, %arg1: i32, %arg2: memref<1x16x17x4xf32, #tpu.memory_space<vmem>>, %arg3: memref<1x1x17x4xf32, #tpu.memory_space<vmem>>, %arg4: memref<4x4x12xf32, #tpu.memory_space<vmem>>, %arg5: memref<1x12xf32, #tpu.memory_space<vmem>>, %arg6: memref<1x16x16x12xf32, #tpu.memory_space<vmem>>) attributes {dimension_semantics = [#tpu.dimension_semantics<parallel>, #tpu.dimension_semantics<parallel>], iteration_bounds = array<i64: 2, 1>, scalar_prefetch = 0 : i64, scratch_operands = 0 : i64, tpu.core_type = #tpu.core_type<tc>, window_params = [{transform_indices = @transform_0, window_bounds = array<i64: 1, 16, 17, 4>}, {transform_indices = @transform_1, window_bounds = array<i64: 1, 1, 17, 4>}, {pipeline_mode = #tpu.pipeline_mode<synchronous>, transform_indices = @transform_2, window_bounds = array<i64: 4, 4, 12>}, {pipeline_mode = #tpu.pipeline_mode<synchronous>, transform_indices = @transform_3, window_bounds = array<i64: 1, 12>}, {transform_indices = @transform_4, window_bounds = array<i64: 1, 16, 16, 12>}]} {
    %c0 = arith.constant 0 : index
    %c0_0 = arith.constant 0 : index
    %c0_1 = arith.constant 0 : index
    %c0_2 = arith.constant 0 : index
    %0 = vector.load %arg2[%c0, %c0_0, %c0_1, %c0_2] : memref<1x16x17x4xf32, #tpu.memory_space<vmem>>, vector<1x16x17x4xf32>
    %1 = vector.shape_cast %0 : vector<1x16x17x4xf32> to vector<16x17x4xf32>
    %c0_3 = arith.constant 0 : index
    %c0_4 = arith.constant 0 : index
    %c0_5 = arith.constant 0 : index
    %c0_6 = arith.constant 0 : index
    %2 = vector.load %arg3[%c0_3, %c0_4, %c0_5, %c0_6] : memref<1x1x17x4xf32, #tpu.memory_space<vmem>>, vector<1x1x17x4xf32>
    %3 = vector.shape_cast %2 : vector<1x1x17x4xf32> to vector<1x17x4xf32>
    %4 = tpu.concatenate %1, %3 in 0 : vector<16x17x4xf32>, vector<1x17x4xf32> -> vector<17x17x4xf32>
    %cst = arith.constant 0.000000e+00 : f32
    %5 = vector.broadcast %cst : f32 to vector<256x12xf32>
    %6 = vector.extract_strided_slice %4 {offsets = [0, 0, 0], sizes = [16, 16, 4], strides = [1, 1, 1]} : vector<17x17x4xf32> to vector<16x16x4xf32>
    %7 = vector.shape_cast %6 : vector<16x16x4xf32> to vector<256x4xf32>
    %c0_7 = arith.constant 0 : index
    %c0_8 = arith.constant 0 : index
    %c0_9 = arith.constant 0 : index
    %8 = vector.load %arg4[%c0_7, %c0_8, %c0_9] : memref<4x4x12xf32, #tpu.memory_space<vmem>>, vector<1x4x12xf32>
    %9 = vector.shape_cast %8 : vector<1x4x12xf32> to vector<4x12xf32>
    %cst_10 = arith.constant dense<0.000000e+00> : vector<256x12xf32>
    %10 = tpu.matmul %7, %9, %cst_10 {dimension_numbers = #tpu.dot_dimension_numbers<[1], [0], [0], [1], [0, 0, 1, 1], [], []>} : vector<256x4xf32>, vector<4x12xf32>, vector<256x12xf32> -> vector<256x12xf32>
    %11 = arith.addf %5, %10 : vector<256x12xf32>
    %12 = vector.extract_strided_slice %4 {offsets = [0, 1, 0], sizes = [16, 16, 4], strides = [1, 1, 1]} : vector<17x17x4xf32> to vector<16x16x4xf32>
    %13 = vector.shape_cast %12 : vector<16x16x4xf32> to vector<256x4xf32>
    %c1 = arith.constant 1 : index
    %c0_11 = arith.constant 0 : index
    %c0_12 = arith.constant 0 : index
    %14 = vector.load %arg4[%c1, %c0_11, %c0_12] : memref<4x4x12xf32, #tpu.memory_space<vmem>>, vector<1x4x12xf32>
    %15 = vector.shape_cast %14 : vector<1x4x12xf32> to vector<4x12xf32>
    %cst_13 = arith.constant dense<0.000000e+00> : vector<256x12xf32>
    %16 = tpu.matmul %13, %15, %cst_13 {dimension_numbers = #tpu.dot_dimension_numbers<[1], [0], [0], [1], [0, 0, 1, 1], [], []>} : vector<256x4xf32>, vector<4x12xf32>, vector<256x12xf32> -> vector<256x12xf32>
    %17 = arith.addf %11, %16 : vector<256x12xf32>
    %18 = vector.extract_strided_slice %4 {offsets = [1, 0, 0], sizes = [16, 16, 4], strides = [1, 1, 1]} : vector<17x17x4xf32> to vector<16x16x4xf32>
    %19 = vector.shape_cast %18 : vector<16x16x4xf32> to vector<256x4xf32>
    %c2 = arith.constant 2 : index
    %c0_14 = arith.constant 0 : index
    %c0_15 = arith.constant 0 : index
    %20 = vector.load %arg4[%c2, %c0_14, %c0_15] : memref<4x4x12xf32, #tpu.memory_space<vmem>>, vector<1x4x12xf32>
    %21 = vector.shape_cast %20 : vector<1x4x12xf32> to vector<4x12xf32>
    %cst_16 = arith.constant dense<0.000000e+00> : vector<256x12xf32>
    %22 = tpu.matmul %19, %21, %cst_16 {dimension_numbers = #tpu.dot_dimension_numbers<[1], [0], [0], [1], [0, 0, 1, 1], [], []>} : vector<256x4xf32>, vector<4x12xf32>, vector<256x12xf32> -> vector<256x12xf32>
    %23 = arith.addf %17, %22 : vector<256x12xf32>
    %24 = vector.extract_strided_slice %4 {offsets = [1, 1, 0], sizes = [16, 16, 4], strides = [1, 1, 1]} : vector<17x17x4xf32> to vector<16x16x4xf32>
    %25 = vector.shape_cast %24 : vector<16x16x4xf32> to vector<256x4xf32>
    %c3 = arith.constant 3 : index
    %c0_17 = arith.constant 0 : index
    %c0_18 = arith.constant 0 : index
    %26 = vector.load %arg4[%c3, %c0_17, %c0_18] : memref<4x4x12xf32, #tpu.memory_space<vmem>>, vector<1x4x12xf32>
    %27 = vector.shape_cast %26 : vector<1x4x12xf32> to vector<4x12xf32>
    %cst_19 = arith.constant dense<0.000000e+00> : vector<256x12xf32>
    %28 = tpu.matmul %25, %27, %cst_19 {dimension_numbers = #tpu.dot_dimension_numbers<[1], [0], [0], [1], [0, 0, 1, 1], [], []>} : vector<256x4xf32>, vector<4x12xf32>, vector<256x12xf32> -> vector<256x12xf32>
    %29 = arith.addf %23, %28 : vector<256x12xf32>
    %c0_20 = arith.constant 0 : index
    %c0_21 = arith.constant 0 : index
    %30 = vector.load %arg5[%c0_20, %c0_21] : memref<1x12xf32, #tpu.memory_space<vmem>>, vector<1x12xf32>
    %31 = vector.broadcast %30 : vector<1x12xf32> to vector<256x12xf32>
    %32 = arith.addf %29, %31 : vector<256x12xf32>
    %33 = vector.shape_cast %32 : vector<256x12xf32> to vector<1x16x16x12xf32>
    %c0_22 = arith.constant 0 : index
    %c0_23 = arith.constant 0 : index
    %c0_24 = arith.constant 0 : index
    %c0_25 = arith.constant 0 : index
    %34 = vector.load %arg6[%c0_22, %c0_23, %c0_24, %c0_25] : memref<1x16x16x12xf32, #tpu.memory_space<vmem>>, vector<1x16x16x12xf32>
    tpu.vector_store %arg6[%c0_22, %c0_23, %c0_24, %c0_25], %33 {strides = array<i32>} : memref<1x16x16x12xf32, #tpu.memory_space<vmem>>, vector<1x16x16x12xf32>,
    return
  }
  func.func @transform_0(%arg0: i32, %arg1: i32) -> (i32, i32, i32, i32) {
    %c0_i32 = arith.constant 0 : i32
    %c0_i32_0 = arith.constant 0 : i32
    %c0_i32_1 = arith.constant 0 : i32
    return %arg0, %arg1, %c0_i32, %c0_i32_0 : i32, i32, i32, i32
  }
  func.func @transform_1(%arg0: i32, %arg1: i32) -> (i32, i32, i32, i32) {
    %c1_i32 = arith.constant 1 : i32
    %0 = arith.addi %arg1, %c1_i32 : i32
    %c16_i32 = arith.constant 16 : i32
    %1 = arith.muli %0, %c16_i32 : i32
    %c0_i32 = arith.constant 0 : i32
    %c0_i32_0 = arith.constant 0 : i32
    %c0_i32_1 = arith.constant 0 : i32
    return %arg0, %1, %c0_i32, %c0_i32_0 : i32, i32, i32, i32
  }
  func.func @transform_2(%arg0: i32, %arg1: i32) -> (i32, i32, i32) {
    %c0_i32 = arith.constant 0 : i32
    %c0_i32_0 = arith.constant 0 : i32
    %c0_i32_1 = arith.constant 0 : i32
    %c0_i32_2 = arith.constant 0 : i32
    return %c0_i32, %c0_i32_0, %c0_i32_1 : i32, i32, i32
  }
  func.func @transform_3(%arg0: i32, %arg1: i32) -> (i32, i32) {
    %c0_i32 = arith.constant 0 : i32
    %c0_i32_0 = arith.constant 0 : i32
    %c0_i32_1 = arith.constant 0 : i32
    return %c0_i32, %c0_i32_0 : i32, i32
  }
  func.func @transform_4(%arg0: i32, %arg1: i32) -> (i32, i32, i32, i32) {
    %c0_i32 = arith.constant 0 : i32
    %c0_i32_0 = arith.constant 0 : i32
    %c0_i32_1 = arith.constant 0 : i32
    return %arg0, %arg1, %c0_i32, %c0_i32_0 : i32, i32, i32, i32
  }
}

</mosaic_0001>

<bundles_post_ra>
// kernel: tpu_custom_call.1
= control target key start
LH: loop header
LB: loop body
LE: loop exit
PB: predicated region body
PF: predicated region fallthrough
CT: control target
= control target key end

     0   :  { %s2371_s15 = smov 0   ;;  %s2373_s16 = smov 0   ;;  %s3218_s0 = inlined_call_operand.vmem [shape: f32[2,17,17,4], index: 0, kind: input, shape index: {}]   ;;  %s3219_s1 = inlined_call_operand.vmem [shape: f32[2,17,17,4], index: 1, kind: input, shape index: {}]   ;;  %s3220_s2 = inlined_call_operand.vmem [shape: f32[4,4,12], index: 2, kind: input, shape index: {}]   ;;  %s3221_s3 = inlined_call_operand.vmem [shape: f32[1,12], index: 3, kind: input, shape index: {}]   ;;  %s3222_s4 = inlined_call_operand.vmem [shape: f32[2,16,16,12], index: 4, kind: output, shape index: {}]  }
   0x1   :  { %s2375_s17 = smov 0  }
   0x2 LB: > { %s26_s18 = sadd.s32 1, %s2340_s16  ;;  %p1817_p0 = scmp.ge.s32.totalorder %s2344_s17, 1  ;;  %s2344_s17 = sphi %s2375_s17, %s14_s17   ;;  %s2340_s16 = sphi %s2373_s16, %s3268_s16   ;;  %s2336_s15 = sphi %s2371_s15, %s3267_s15  }
   0x3   : > { %p28_p1 = scmp.ge.s32.totalorder %s26_s18, 2  ;;  %p218_p2 = scmp.lt.s32.totalorder %s2344_s17, 3 }
   0x5   : > { %s3270_s18 = smov (%p28_p1, %s26_s18), 0  ;;  %p219_p3 = pnand %p1817_p0, %p218_p2 }
   0x7   : > { %222 = sbr.rel (%p219_p3) target bundleno = 349 (0x15d), region = 36 }
   0xc   : > { %v1822_v0 = vld [vmem:[%s3220_s2 + $0x4] sm:$0xf]  ;;  %vm563_vm0 = vcmask 1043456   ;;  %v366_v1 = vld [vmem:[%s3220_s2] sm:$0xf]  ;;  %p276_p4 = scmp.lt.s32.totalorder %s2336_s15, 1 }
   0xd   : > { %2095 = vmatprep.subr.msk.mxu0 %vm563_vm0, %v1822_v0  ;;  %2145 = vmatprep.subr.msk.mxu1 %vm563_vm0, %v366_v1  ;;  %v1889_v2 = vld [vmem:[%s3220_s2 + $0x8] sm:$0xf]  ;;  %v1923_v3 = vld [vmem:[%s3220_s2 + $0xc] sm:$0xf]  ;;  %vm498_vm1 = vcmask 31744   ;;  %vm415_vm2 = vcmask 1046528  }
   0xe   : > { %2096 = vmatpush3.msk.msra.mxu0 %vm563_vm0, %v1822_v0  ;;  %s3272_s15 = smov (!%p276_p4, %s2336_s15), 1  ;;  %2146 = vmatpush3.msk.msra.mxu1 %vm563_vm0, %v366_v1  ;;  %vm1663_vm3 = vcmask 97280  }
   0xf   : > { %2195 = vmatprep.subr.msk.mxu0 %vm563_vm0, %v1889_v2  ;;  %2245 = vmatprep.subr.msk.mxu1 %vm563_vm0, %v1923_v3  ;;  %s2295_s27 = smul.u32 408, %s3272_s15  ;;  %s1962_s9 = sshll.u32 %s3272_s15, 8 }
  0x10   : > { %s3053_s14 = scalar_lea.vmem %s3222_s4, %s1962_s9 }
  0x11   : > { %s2415_s30 = scalar_lea.vmem %s3218_s0, %s2295_s27  ;;  %s1961_s5 = sadd.s32 384, %s2295_s27 }
  0x12   : > { %v315_v4 = vld [vmem:[%s2415_s30] sm:$0xff]  ;;  %v316_v5 = vld [vmem:[%s2415_s30 + $0x8] sm:$0xff]  ;;  %v317_v6 = vld [vmem:[%s2415_s30 + $0x10] sm:$0x1]  ;;  %s301_s8 = scalar_lea.vmem %s3219_s1, %s1961_s5 }
  0x13   : > { %v416_v7 = vrot.slane %v315_v4, 1  ;;  %v417_v8 = vrot.slane %v316_v5, 1  ;;  %2147 = vmatprep.mubr.msk.f32.mxu1 %vm498_vm1, %v315_v4  ;;  %v419_v9 = vrot.slane %v317_v6, 1  ;;  %v2422_v10 = vld [vmem:[%s2415_s30 + $0x18] sm:$0xff]  ;;  %v2425_v11 = vld [vmem:[%s2415_s30 + $0x20] sm:$0xff]  ;;  %v2428_v12 = vld [vmem:[%s2415_s30 + $0x30] sm:$0xff] }
  0x14   : > { %2148 = vmatmul.mubr.msk.f32.vlgmr.msra.gmra.mxu1 %vm498_vm1, %v316_v5  ;;  %v421_v13 = vrot.slane %v2422_v10, 1  ;;  %v422_v14 = vrot.slane %v2425_v11, 1  ;;  %v320_v15 = vld [vmem:[%s2415_s30 + $0x28] sm:$0x1]  ;;  %v2435_v16 = vld [vmem:[%s2415_s30 + $0x38] sm:$0xff]  ;;  %v426_v17 = vrot.slane %v2428_v12, 1 }
  0x15   : > { %v418_v18 = vsel %vm415_vm2, %v416_v7, %v417_v8  ;;  %v420_v19 = vsel %vm415_vm2, %v417_v8, %v419_v9  ;;  %2246 = vmatpush3.msk.msra.mxu1 %vm563_vm0, %v1923_v3  ;;  %2150 = vmatprep.mubr.msk.f32.mxu1 %vm498_vm1, %v2422_v10  ;;  %v424_v20 = vrot.slane %v320_v15, 1  ;;  %v427_v21 = vrot.slane %v2435_v16, 1  ;;  %v323_v22 = vld [vmem:[%s2415_s30 + $0x40] sm:$0x1]  ;;  %v2450_v24 = vld [vmem:[%s2415_s30 + $0x48] sm:$0xff]  ;;  %v2453_v25 = vld [vmem:[%s2415_s30 + $0x50] sm:$0xff] }
  0x16   : > { %2097 = vmatprep.mubr.msk.f32.mxu0 %vm498_vm1, %v418_v18  ;;  %v2447_v23 = vsel %vm415_vm2, %v421_v13, %v422_v14  ;;  %v429_v27 = vrot.slane %v323_v22, 1  ;;  %v431_v29 = vrot.slane %v2450_v24, 1  ;;  %v432_v30 = vrot.slane %v2453_v25, 1  ;;  %v326_v31 = vld [vmem:[%s2415_s30 + $0x58] sm:$0x1]  ;;  %v2473_v32 = vld [vmem:[%s2415_s30 + $0x60] sm:$0xff] }
  0x17   : > { %2098 = vmatmul.mubr.msk.f32.vlgmr.msra.gmra.mxu0 %vm498_vm1, %v420_v19  ;;  %v2460_v26 = vsel %vm415_vm2, %v422_v14, %v424_v20  ;;  %v2465_v28 = vsel %vm415_vm2, %v426_v17, %v427_v21  ;;  %v2476_v33 = vld [vmem:[%s2415_s30 + $0x68] sm:$0xff]  ;;  %v434_v35 = vrot.slane %v326_v31, 1  ;;  %v436_v37 = vrot.slane %v2473_v32, 1  ;;  %v329_v39 = vld [vmem:[%s2415_s30 + $0x70] sm:$0x1]  ;;  %v2496_v40 = vld [vmem:[%s2415_s30 + $0x78] sm:$0xff] }
  0x18   : > { %2196 = vmatpush3.msk.msra.mxu0 %vm563_vm0, %v1889_v2  ;;  %2100 = vmatprep.mubr.msk.f32.mxu0 %vm498_vm1, %v2447_v23  ;;  %v2483_v34 = vsel %vm415_vm2, %v427_v21, %v429_v27  ;;  %v2488_v36 = vsel %vm415_vm2, %v431_v29, %v432_v30  ;;  %v437_v38 = vrot.slane %v2476_v33, 1  ;;  %v2499_v41 = vld [vmem:[%s2415_s30 + $0x80] sm:$0xff]  ;;  %v439_v43 = vrot.slane %v329_v39, 1  ;;  %v332_v47 = vld [vmem:[%s2415_s30 + $0x88] sm:$0x1]  ;;  %v2524_v48 = vld [vmem:[%s2415_s30 + $0x90] sm:$0xff] }
  0x19   : > { %2151 = vmatmul.mubr.msk.f32.gmra.mxu1 %vm498_vm1, %v2425_v11  ;;  %v2508_v42 = vsel %vm415_vm2, %v432_v30, %v434_v35  ;;  %v441_v45 = vrot.slane %v2496_v40, 1  ;;  %v442_v46 = vrot.slane %v2499_v41, 1  ;;  %v2527_v49 = vld [vmem:[%s2415_s30 + $0x98] sm:$0xff]  ;;  %v444_v51 = vrot.slane %v332_v47, 1  ;;  %v2536_v52 = vld [vmem:[%s301_s8] sm:$0xff]  ;;  %v2538_v53 = vld [vmem:[%s301_s8 + $0x8] sm:$0xff] }
  0x1a   : > { %2153 = vmatprep.mubr.msk.f32.mxu1 %vm498_vm1, %v2428_v12  ;;  %v2513_v44 = vsel %vm415_vm2, %v436_v37, %v437_v38  ;;  %v2534_v50 = vsel %vm415_vm2, %v437_v38, %v439_v43  ;;  %3227 = vst [vmem:[#allocation2_spill] sm:$0xff] %v2536_v52  ;;  %3228 = vst [vmem:[#allocation3_spill] sm:$0xff] %v2538_v53  ;;  %v365_v54 = vld [vmem:[%s301_s8 + $0x10] sm:$0x1]  ;;  %v446_v56 = vrot.slane %v2524_v48, 1  ;;  %v447_v57 = vrot.slane %v2527_v49, 1 }
  0x1b   : > { %2101 = vmatmul.mubr.msk.f32.gmra.mxu0 %vm498_vm1, %v2460_v26  ;;  %v2543_v55 = vsel %vm415_vm2, %v441_v45, %v442_v46  ;;  %v335_v58 = vld [vmem:[%s2415_s30 + $0xa0] sm:$0x1]  ;;  %v2549_v59 = vld [vmem:[%s2415_s30 + $0xa8] sm:$0xff]  ;;  %v2554_v60 = vld [vmem:[%s2415_s30 + $0xb0] sm:$0xff]  ;;  %v1353_v61 = vrot.slane %v2536_v52, 1  ;;  %v1354_v62 = vrot.slane %v2538_v53, 1  ;;  %v2563_v0 = vsel %vm415_vm2, %v442_v46, %v444_v51 }
  0x1c   : > { %2103 = vmatprep.mubr.msk.f32.mxu0 %vm498_vm1, %v2465_v28  ;;  %v1356_v63 = vrot.slane %v365_v54, 1  ;;  %v449_v1 = vrot.slane %v335_v58, 1  ;;  %v451_v2 = vrot.slane %v2549_v59, 1  ;;  %v2569_v3 = vsel %vm415_vm2, %v446_v56, %v447_v57  ;;  %v338_v5 = vld [vmem:[%s2415_s30 + $0xb8] sm:$0x1]  ;;  %v2582_v8 = vld [vmem:[%s2415_s30 + $0xc0] sm:$0xff] }
  0x1d   : > { %2154 = vmatmul.mubr.msk.f32.gmra.mxu1 %vm498_vm1, %v2435_v16  ;;  %v452_v4 = vrot.slane %v2554_v60, 1  ;;  %v2574_v6 = vsel %vm415_vm2, %v1353_v61, %v1354_v62  ;;  %v2585_v9 = vld [vmem:[%s2415_s30 + $0xc8] sm:$0xff]  ;;  %v454_v14 = vrot.slane %v338_v5, 1  ;;  %v456_v17 = vrot.slane %v2582_v8, 1  ;;  %v341_v19 = vld [vmem:[%s2415_s30 + $0xd0] sm:$0x1] }
  0x1e   : > { %2156 = vmatprep.mubr.msk.f32.mxu1 %vm498_vm1, %v2450_v24  ;;  %3229 = vst [vmem:[#allocation4_spill] sm:$0xff] %v2574_v6  ;;  %v2577_v7 = vsel %vm415_vm2, %v1354_v62, %v1356_v63  ;;  %v2592_v13 = vsel %vm415_vm2, %v447_v57, %v449_v1  ;;  %v457_v18 = vrot.slane %v2585_v9, 1  ;;  %v2605_v20 = vld [vmem:[%s2415_s30 + $0xd8] sm:$0xff]  ;;  %v2608_v21 = vld [vmem:[%s2415_s30 + $0xe0] sm:$0xff]  ;;  %v459_v27 = vrot.slane %v341_v19, 1  ;;  %v2628_v37 = vld [vmem:[%s2415_s30 + $0xf0] sm:$0xff] }
  0x1f   : > { %2104 = vmatmul.mubr.msk.f32.gmra.mxu0 %vm498_vm1, %v2483_v34  ;;  %3230 = vst [vmem:[#allocation5_spill] sm:$0xff] %v2577_v7  ;;  %v2597_v15 = vsel %vm415_vm2, %v451_v2, %v452_v4  ;;  %v2615_v22 = vsel %vm415_vm2, %v452_v4, %v454_v14  ;;  %v461_v30 = vrot.slane %v2605_v20, 1  ;;  %v462_v31 = vrot.slane %v2608_v21, 1  ;;  %v344_v35 = vld [vmem:[%s2415_s30 + $0xe8] sm:$0x1]  ;;  %v2631_v38 = vld [vmem:[%s2415_s30 + $0xf8] sm:$0xff] }
  0x20   : > { %2106 = vmatprep.mubr.msk.f32.mxu0 %vm498_vm1, %v2488_v36  ;;  %v2620_v29 = vsel %vm415_vm2, %v456_v17, %v457_v18  ;;  %v2638_v39 = vsel %vm415_vm2, %v457_v18, %v459_v27  ;;  %v464_v43 = vrot.slane %v344_v35, 1  ;;  %v466_v46 = vrot.slane %v2628_v37, 1  ;;  %v347_v51 = vld [vmem:[%s2415_s30 + $0x100] sm:$0x1]  ;;  %v2651_v54 = vld [vmem:[%s2415_s30 + $0x108] sm:$0xff]  ;;  %v2654_v56 = vld [vmem:[%s2415_s30 + $0x110] sm:$0xff] }
  0x21   : > { %2157 = vmatmul.mubr.msk.f32.gmra.mxu1 %vm498_vm1, %v2453_v25  ;;  %v2643_v45 = vsel %vm415_vm2, %v461_v30, %v462_v31  ;;  %v467_v47 = vrot.slane %v2631_v38, 1  ;;  %v469_v58 = vrot.slane %v347_v51, 1  ;;  %v471_v62 = vrot.slane %v2651_v54, 1  ;;  %v350_v1 = vld [vmem:[%s2415_s30 + $0x118] sm:$0x1]  ;;  %v2674_v2 = vld [vmem:[%s2415_s30 + $0x120] sm:$0xff] }
  0x22   : > { %2159 = vmatprep.mubr.msk.f32.mxu1 %vm498_vm1, %v2473_v32  ;;  %v2661_v57 = vsel %vm415_vm2, %v462_v31, %v464_v43  ;;  %v472_v63 = vrot.slane %v2654_v56, 1  ;;  %v2677_v4 = vld [vmem:[%s2415_s30 + $0x128] sm:$0xff]  ;;  %v474_v14 = vrot.slane %v350_v1, 1  ;;  %v476_v18 = vrot.slane %v2674_v2, 1  ;;  %v353_v27 = vld [vmem:[%s2415_s30 + $0x130] sm:$0x1] }
  0x23   : > { %2107 = vmatmul.mubr.msk.f32.gmra.mxu0 %vm498_vm1, %v2508_v42  ;;  %v2666_v61 = vsel %vm415_vm2, %v466_v46, %v467_v47  ;;  %3231 = vst [vmem:[#allocation6_spill] sm:$0xff] %v2677_v4  ;;  %v2684_v5 = vsel %vm415_vm2, %v467_v47, %v469_v58  ;;  %v477_v19 = vrot.slane %v2677_v4, 1  ;;  %v2697_v30 = vld [vmem:[%s2415_s30 + $0x138] sm:$0xff]  ;;  %v2700_v31 = vld [vmem:[%s2415_s30 + $0x140] sm:$0xff]  ;;  %v479_v43 = vrot.slane %v353_v27, 1  ;;  %v2743_v52 = vld [vmem:[%s2415_s30 + $0x168] sm:$0xff] }
  0x24   : > { %2109 = vmatprep.mubr.msk.f32.mxu0 %vm498_vm1, %v2513_v44  ;;  %v2689_v17 = vsel %vm415_vm2, %v471_v62, %v472_v63  ;;  %3232 = vst [vmem:[#allocation7_spill] sm:$0xff] %v2697_v30  ;;  %v2707_v35 = vsel %vm415_vm2, %v472_v63, %v474_v14  ;;  %v481_v47 = vrot.slane %v2697_v30, 1  ;;  %v482_v51 = vrot.slane %v2700_v31, 1  ;;  %v356_v58 = vld [vmem:[%s2415_s30 + $0x148] sm:$0x1]  ;;  %v2720_v62 = vld [vmem:[%s2415_s30 + $0x150] sm:$0xff] }
  0x25   : > { %2160 = vmatmul.mubr.msk.f32.gmra.mxu1 %vm498_vm1, %v2476_v33  ;;  %v2712_v46 = vsel %vm415_vm2, %v476_v18, %v477_v19  ;;  %v2723_v63 = vld [vmem:[%s2415_s30 + $0x158] sm:$0xff]  ;;  %v2730_v1 = vsel %vm415_vm2, %v477_v19, %v479_v43  ;;  %v484_v14 = vrot.slane %v356_v58, 1  ;;  %v486_v27 = vrot.slane %v2720_v62, 1  ;;  %v359_v7 = vld [vmem:[%s2415_s30 + $0x160] sm:$0x1]  ;;  %v2746_v19 = vld [vmem:[%s2415_s30 + $0x170] sm:$0xff] }
  0x26   : > { %2162 = vmatprep.mubr.msk.f32.mxu1 %vm498_vm1, %v2496_v40  ;;  %v2735_v18 = vsel %vm415_vm2, %v481_v47, %v482_v51  ;;  %v487_v53 = vrot.slane %v2723_v63, 1  ;;  %v489_v47 = vrot.slane %v359_v7, 1  ;;  %v491_v6 = vrot.slane %v2743_v52, 1 }
  0x27   : > { %2110 = vmatmul.mubr.msk.f32.gmra.mxu0 %vm498_vm1, %v2534_v50  ;;  %v2753_v43 = vsel %vm415_vm2, %v482_v51, %v484_v14 }
  0x28   : > { %2112 = vmatprep.mubr.msk.f32.mxu0 %vm498_vm1, %v2543_v55  ;;  %v2758_v58 = vsel %vm415_vm2, %v486_v27, %v487_v53  ;;  %v2770_v7 = vsel %vm415_vm2, %v487_v53, %v489_v47 }
  0x29   : > { %2163 = vmatmul.mubr.msk.f32.gmra.mxu1 %vm498_vm1, %v2499_v41 }
  0x2a   : > { %2165 = vmatprep.mubr.msk.f32.mxu1 %vm498_vm1, %v2524_v48 }
  0x2b   : > { %2113 = vmatmul.mubr.msk.f32.gmra.mxu0 %vm498_vm1, %v2563_v0 }
  0x2c   : > { %2115 = vmatprep.mubr.msk.f32.mxu0 %vm498_vm1, %v2569_v3 }
  0x2d   : > { %2166 = vmatmul.mubr.msk.f32.gmra.mxu1 %vm498_vm1, %v2527_v49 }
  0x2e   : > { %2168 = vmatprep.mubr.msk.f32.mxu1 %vm498_vm1, %v2549_v59 }
  0x2f   : > { %2116 = vmatmul.mubr.msk.f32.gmra.mxu0 %vm498_vm1, %v2592_v13 }
  0x30   : > { %2118 = vmatprep.mubr.msk.f32.mxu0 %vm498_vm1, %v2597_v15 }
  0x31   : > { %2169 = vmatmul.mubr.msk.f32.gmra.mxu1 %vm498_vm1, %v2554_v60 }
  0x32   : > { %2171 = vmatprep.mubr.msk.f32.mxu1 %vm498_vm1, %v2582_v8 }
  0x33   : > { %2119 = vmatmul.mubr.msk.f32.gmra.mxu0 %vm498_vm1, %v2615_v22 }
  0x34   : > { %2121 = vmatprep.mubr.msk.f32.mxu0 %vm498_vm1, %v2620_v29 }
  0x35   : > { %2172 = vmatmul.mubr.msk.f32.gmra.mxu1 %vm498_vm1, %v2585_v9 }
  0x36   : > { %2174 = vmatprep.mubr.msk.f32.mxu1 %vm498_vm1, %v2605_v20 }
  0x37   : > { %2122 = vmatmul.mubr.msk.f32.gmra.mxu0 %vm498_vm1, %v2638_v39 }
  0x38   : > { %2124 = vmatprep.mubr.msk.f32.mxu0 %vm498_vm1, %v2643_v45 }
  0x39   : > { %2175 = vmatmul.mubr.msk.f32.gmra.mxu1 %vm498_vm1, %v2608_v21 }
  0x3a   : > { %2177 = vmatprep.mubr.msk.f32.mxu1 %vm498_vm1, %v2628_v37 }
  0x3b   : > { %2125 = vmatmul.mubr.msk.f32.gmra.mxu0 %vm498_vm1, %v2661_v57 }
  0x3c   : > { %2127 = vmatprep.mubr.msk.f32.mxu0 %vm498_vm1, %v2666_v61 }
  0x3d   : > { %2178 = vmatmul.mubr.msk.f32.gmra.mxu1 %vm498_vm1, %v2631_v38 }
  0x3e   : > { %2180 = vmatprep.mubr.msk.f32.mxu1 %vm498_vm1, %v2651_v54 }
  0x3f   : > { %2128 = vmatmul.mubr.msk.f32.gmra.mxu0 %vm498_vm1, %v2684_v5 }
  0x40   : > { %2130 = vmatprep.mubr.msk.f32.mxu0 %vm498_vm1, %v2689_v17 }
  0x41   : > { %2181 = vmatmul.mubr.msk.f32.gmra.mxu1 %vm498_vm1, %v2654_v56 }
  0x42   : > { %2183 = vmatprep.mubr.msk.f32.mxu1 %vm498_vm1, %v2674_v2 }
  0x43   : > { %2131 = vmatmul.mubr.msk.f32.gmra.mxu0 %vm498_vm1, %v2707_v35 }
  0x44   : > { %2133 = vmatprep.mubr.msk.f32.mxu0 %vm498_vm1, %v2712_v46 }
  0x45   : > { %2184 = vmatmul.mubr.msk.f32.gmra.mxu1 %vm498_vm1, %v2677_v4  ;;  %v362_v4 = vld [vmem:[%s2415_s30 + $0x178] sm:$0x1] }
  0x46   : > { %2186 = vmatprep.mubr.msk.f32.mxu1 %vm498_vm1, %v2697_v30  ;;  %v492_v30 = vrot.slane %v2746_v19, 1  ;;  %v494_v51 = vrot.slane %v362_v4, 1 }
  0x47   : > { %2134 = vmatmul.mubr.msk.f32.gmra.mxu0 %vm498_vm1, %v2730_v1 }
  0x48   : > { %2136 = vmatprep.mubr.msk.f32.mxu0 %vm498_vm1, %v2735_v18  ;;  %v493_v14 = vsel %vm415_vm2, %v491_v6, %v492_v30  ;;  %v495_v27 = vsel %vm415_vm2, %v492_v30, %v494_v51 }
  0x49   : > { %2187 = vmatmul.mubr.msk.f32.gmra.mxu1 %vm498_vm1, %v2700_v31 }
  0x4a   : > { %2189 = vmatprep.mubr.msk.f32.mxu1 %vm498_vm1, %v2720_v62 }
  0x4b   : > { %2137 = vmatmul.mubr.msk.f32.gmra.mxu0 %vm498_vm1, %v2753_v43 }
  0x4c   : > { %2139 = vmatprep.mubr.msk.f32.mxu0 %vm498_vm1, %v2758_v58 }
  0x4d   : > { %2190 = vmatmul.mubr.msk.f32.gmra.mxu1 %vm498_vm1, %v2723_v63 }
  0x4e   : > { %2192 = vmatprep.mubr.msk.f32.mxu1 %vm498_vm1, %v2743_v52 }
  0x4f   : > { %2140 = vmatmul.mubr.msk.f32.gmra.mxu0 %vm498_vm1, %v2770_v7 }
  0x50   : > { %2142 = vmatprep.mubr.msk.f32.mxu0 %vm498_vm1, %v493_v14 }
  0x51   : > { %2193 = vmatmul.mubr.msk.f32.gmra.mxu1 %vm498_vm1, %v2746_v19 }
  0x52   : > { %2247 = vmatprep.mubr.msk.f32.mxu1 %vm498_vm1, %v2447_v23  ;;  %v3237_v23 = vld [vmem:[#allocation5_spill] sm:$0xff] }
  0x53   : > { %2143 = vmatmul.mubr.msk.f32.gmra.mxu0 %vm498_vm1, %v495_v27 }
  0x54   : > { %2197 = vmatprep.mubr.msk.f32.mxu0 %vm498_vm1, %v2422_v10  ;;  %v3233_v10 = vld [vmem:[#allocation6_spill] sm:$0xff] }
  0x55   : > { %2248 = vmatmul.mubr.msk.f32.vlgmr.msra.gmra.mxu1 %vm498_vm1, %v2460_v26 }
  0x56   : > { %2250 = vmatprep.mubr.msk.f32.mxu1 %vm498_vm1, %v2465_v28 }
  0x57   : > { %2198 = vmatmul.mubr.msk.f32.vlgmr.msra.gmra.mxu0 %vm498_vm1, %v2425_v11  ;;  %v3234_v11 = vld [vmem:[#allocation7_spill] sm:$0xff] }
  0x58   : > { %2200 = vmatprep.mubr.msk.f32.mxu0 %vm498_vm1, %v2428_v12  ;;  %v3235_v12 = vld [vmem:[#allocation4_spill] sm:$0xff] }
  0x59   : > { %2251 = vmatmul.mubr.msk.f32.gmra.mxu1 %vm498_vm1, %v2483_v34 }
  0x5a   : > { %2253 = vmatprep.mubr.msk.f32.mxu1 %vm498_vm1, %v2488_v36 }
  0x5b   : > { %2201 = vmatmul.mubr.msk.f32.gmra.mxu0 %vm498_vm1, %v2435_v16  ;;  %v3236_v16 = vld [vmem:[#allocation2_spill] sm:$0xff] }
  0x5c   : > { %2203 = vmatprep.mubr.msk.f32.mxu0 %vm498_vm1, %v2450_v24  ;;  %v3238_v24 = vld [vmem:[#allocation3_spill] sm:$0xff] }
  0x5d   : > { %2254 = vmatmul.mubr.msk.f32.gmra.mxu1 %vm498_vm1, %v2508_v42 }
  0x5e   : > { %2256 = vmatprep.mubr.msk.f32.mxu1 %vm498_vm1, %v2513_v44 }
  0x5f   : > { %2204 = vmatmul.mubr.msk.f32.gmra.mxu0 %vm498_vm1, %v2453_v25 }
  0x60   : > { %2206 = vmatprep.mubr.msk.f32.mxu0 %vm498_vm1, %v2473_v32 }
  0x61   : > { %2257 = vmatmul.mubr.msk.f32.gmra.mxu1 %vm498_vm1, %v2534_v50 }
  0x62   : > { %2259 = vmatprep.mubr.msk.f32.mxu1 %vm498_vm1, %v2543_v55 }
  0x63   : > { %2207 = vmatmul.mubr.msk.f32.gmra.mxu0 %vm498_vm1, %v2476_v33 }
  0x64   : > { %2209 = vmatprep.mubr.msk.f32.mxu0 %vm498_vm1, %v2496_v40 }
  0x65   : > { %2260 = vmatmul.mubr.msk.f32.gmra.mxu1 %vm498_vm1, %v2563_v0 }
  0x66   : > { %2262 = vmatprep.mubr.msk.f32.mxu1 %vm498_vm1, %v2569_v3 }
  0x67   : > { %2210 = vmatmul.mubr.msk.f32.gmra.mxu0 %vm498_vm1, %v2499_v41 }
  0x68   : > { %2212 = vmatprep.mubr.msk.f32.mxu0 %vm498_vm1, %v2524_v48 }
  0x69   : > { %2263 = vmatmul.mubr.msk.f32.gmra.mxu1 %vm498_vm1, %v2592_v13 }
  0x6a   : > { %2265 = vmatprep.mubr.msk.f32.mxu1 %vm498_vm1, %v2597_v15 }
  0x6b   : > { %2213 = vmatmul.mubr.msk.f32.gmra.mxu0 %vm498_vm1, %v2527_v49 }
  0x6c   : > { %2215 = vmatprep.mubr.msk.f32.mxu0 %vm498_vm1, %v2549_v59 }
  0x6d   : > { %2266 = vmatmul.mubr.msk.f32.gmra.mxu1 %vm498_vm1, %v2615_v22 }
  0x6e   : > { %2268 = vmatprep.mubr.msk.f32.mxu1 %vm498_vm1, %v2620_v29 }
  0x6f   : > { %2216 = vmatmul.mubr.msk.f32.gmra.mxu0 %vm498_vm1, %v2554_v60 }
  0x70   : > { %2218 = vmatprep.mubr.msk.f32.mxu0 %vm498_vm1, %v2582_v8 }
  0x71   : > { %2269 = vmatmul.mubr.msk.f32.gmra.mxu1 %vm498_vm1, %v2638_v39 }
  0x72   : > { %2271 = vmatprep.mubr.msk.f32.mxu1 %vm498_vm1, %v2643_v45 }
  0x73   : > { %2219 = vmatmul.mubr.msk.f32.gmra.mxu0 %vm498_vm1, %v2585_v9 }
  0x74   : > { %2221 = vmatprep.mubr.msk.f32.mxu0 %vm498_vm1, %v2605_v20 }
  0x75   : > { %2272 = vmatmul.mubr.msk.f32.gmra.mxu1 %vm498_vm1, %v2661_v57 }
  0x76   : > { %2274 = vmatprep.mubr.msk.f32.mxu1 %vm498_vm1, %v2666_v61 }
  0x77   : > { %2222 = vmatmul.mubr.msk.f32.gmra.mxu0 %vm498_vm1, %v2608_v21 }
  0x78   : > { %2224 = vmatprep.mubr.msk.f32.mxu0 %vm498_vm1, %v2628_v37 }
  0x79   : > { %2275 = vmatmul.mubr.msk.f32.gmra.mxu1 %vm498_vm1, %v2684_v5 }
  0x7a   : > { %2277 = vmatprep.mubr.msk.f32.mxu1 %vm498_vm1, %v2689_v17 }
  0x7b   : > { %2225 = vmatmul.mubr.msk.f32.gmra.mxu0 %vm498_vm1, %v2631_v38 }
  0x7c   : > { %2227 = vmatprep.mubr.msk.f32.mxu0 %vm498_vm1, %v2651_v54 }
  0x7d   : > { %2278 = vmatmul.mubr.msk.f32.gmra.mxu1 %vm498_vm1, %v2707_v35 }
  0x7e   : > { %2280 = vmatprep.mubr.msk.f32.mxu1 %vm498_vm1, %v2712_v46 }
  0x7f   : > { %2228 = vmatmul.mubr.msk.f32.gmra.mxu0 %vm498_vm1, %v2654_v56 }
  0x80   : > { %2230 = vmatprep.mubr.msk.f32.mxu0 %vm498_vm1, %v2674_v2 }
  0x81   : > { %2281 = vmatmul.mubr.msk.f32.gmra.mxu1 %vm498_vm1, %v2730_v1 }
  0x82   : > { %2283 = vmatprep.mubr.msk.f32.mxu1 %vm498_vm1, %v2735_v18 }
  0x83   : > { %2231 = vmatmul.mubr.msk.f32.gmra.mxu0 %vm498_vm1, %v3233_v10 }
  0x84   : > { %2233 = vmatprep.mubr.msk.f32.mxu0 %vm498_vm1, %v3234_v11 }
  0x85   : > { %2284 = vmatmul.mubr.msk.f32.gmra.mxu1 %vm498_vm1, %v2753_v43 }
  0x86   : > { %2286 = vmatprep.mubr.msk.f32.mxu1 %vm498_vm1, %v2758_v58 }
  0x87   : > { %2234 = vmatmul.mubr.msk.f32.gmra.mxu0 %vm498_vm1, %v2700_v31 }
  0x88   : > { %2236 = vmatprep.mubr.msk.f32.mxu0 %vm498_vm1, %v2720_v62 }
  0x89   : > { %2287 = vmatmul.mubr.msk.f32.gmra.mxu1 %vm498_vm1, %v2770_v7 }
  0x8a   : > { %2289 = vmatprep.mubr.msk.f32.mxu1 %vm498_vm1, %v493_v14 }
  0x8b   : > { %2237 = vmatmul.mubr.msk.f32.gmra.mxu0 %vm498_vm1, %v2723_v63 }
  0x8c   : > { %2239 = vmatprep.mubr.msk.f32.mxu0 %vm498_vm1, %v2743_v52 }
  0x8d   : > { %2290 = vmatmul.mubr.msk.f32.gmra.mxu1 %vm498_vm1, %v495_v27 }
  0x8e   : > { %2292 = vmatprep.mubr.msk.f32.mxu1 %vm498_vm1, %v3235_v12 }
  0x8f   : > { %2240 = vmatmul.mubr.msk.f32.gmra.mxu0 %vm498_vm1, %v2746_v19 }
  0x90   : > { %2242 = vmatprep.mubr.msk.f32.mxu0 %vm498_vm1, %v3236_v16 }
  0x91   : > { %2293 = vmatmul.mubr.msk.f32.gmra.mxu1 %vm498_vm1, %v3237_v23 }
  0x93   : > { %2243 = vmatmul.mubr.msk.f32.gmra.mxu0 %vm498_vm1, %v3238_v24 }
  0xd4   : > { %v2910_v25 = vpop.f32.mrf.mxu1 }
  0xd6   : > { %v2912_v26 = vpop.f32.mrf.mxu1 }
  0xd7   : > { %v2914_v28 = vpop.f32.mrf.mxu0 }
  0xd9   : > { %v2916_v32 = vpop.f32.mrf.mxu0  ;;  %v2918_v33 = vpop.f32.mrf.mxu1 }
  0xdb   : > { %v2920_v34 = vpop.f32.mrf.mxu0  ;;  %v2922_v36 = vpop.f32.mrf.mxu1 }
  0xdd   : > { %v2924_v40 = vpop.f32.mrf.mxu0  ;;  %v2926_v41 = vpop.f32.mrf.mxu1 }
  0xdf   : > { %v2928_v42 = vpop.f32.mrf.mxu0  ;;  %v2930_v44 = vpop.f32.mrf.mxu1 }
  0xe1   : > { %v2932_v48 = vpop.f32.mrf.mxu0  ;;  %v2934_v49 = vpop.f32.mrf.mxu1 }
  0xe3   : > { %v2936_v50 = vpop.f32.mrf.mxu0  ;;  %v2938_v52 = vpop.f32.mrf.mxu1 }
  0xe5   : > { %v2940_v53 = vpop.f32.mrf.mxu0  ;;  %v2942_v55 = vpop.f32.mrf.mxu1 }
  0xe7   : > { %v2944_v59 = vpop.f32.mrf.mxu0  ;;  %v2946_v60 = vpop.f32.mrf.mxu1 }
  0xe9   : > { %v2948_v0 = vpop.f32.mrf.mxu0  ;;  %v2950_v3 = vpop.f32.mrf.mxu1 }
  0xeb   : > { %v2952_v6 = vpop.f32.mrf.mxu0  ;;  %v2954_v8 = vpop.f32.mrf.mxu1 }
  0xed   : > { %v2956_v9 = vpop.f32.mrf.mxu0  ;;  %v2958_v13 = vpop.f32.mrf.mxu1 }
  0xef   : > { %v2960_v15 = vpop.f32.mrf.mxu0  ;;  %v2962_v20 = vpop.f32.mrf.mxu1 }
  0xf1   : > { %v2964_v21 = vpop.f32.mrf.mxu0  ;;  %v2966_v22 = vpop.f32.mrf.mxu1 }
  0xf3   : > { %v2968_v29 = vpop.f32.mrf.mxu0  ;;  %v2970_v37 = vpop.f32.mrf.mxu1 }
  0xf5   : > { %v2972_v38 = vpop.f32.mrf.mxu0  ;;  %v2974_v39 = vpop.f32.mrf.mxu1 }
  0xf7   : > { %v2976_v45 = vpop.f32.mrf.mxu0  ;;  %v2978_v54 = vpop.f32.mrf.mxu1 }
  0xf9   : > { %v2980_v56 = vpop.f32.mrf.mxu0  ;;  %v2982_v57 = vpop.f32.mrf.mxu1 }
  0xfb   : > { %v2984_v61 = vpop.f32.mrf.mxu0  ;;  %v2986_v2 = vpop.f32.mrf.mxu1 }
  0xfd   : > { %v2988_v4 = vpop.f32.mrf.mxu0  ;;  %v2990_v5 = vpop.f32.mrf.mxu1 }
  0xff   : > { %v2992_v17 = vpop.f32.mrf.mxu0  ;;  %v2994_v30 = vpop.f32.mrf.mxu1 }
 0x101   : > { %v2996_v31 = vpop.f32.mrf.mxu0  ;;  %v2998_v35 = vpop.f32.mrf.mxu1 }
 0x103   : > { %v3000_v46 = vpop.f32.mrf.mxu0  ;;  %v3002_v62 = vpop.f32.mrf.mxu1 }
 0x105   : > { %v3004_v63 = vpop.f32.mrf.mxu0  ;;  %v3006_v1 = vpop.f32.mrf.mxu1 }
 0x107   : > { %v3008_v18 = vpop.f32.mrf.mxu0  ;;  %v3010_v19 = vpop.f32.mrf.mxu1 }
 0x108   : > { %3239 = vst [vmem:[#allocation6_spill] sm:$0xff] %v3010_v19 }
 0x109   : > { %v3012_v43 = vpop.f32.mrf.mxu0  ;;  %v3014_v47 = vpop.f32.mrf.mxu1 }
 0x10a   : > { %3240 = vst [vmem:[#allocation7_spill] sm:$0xff] %v3012_v43  ;;  %3241 = vst [vmem:[#allocation4_spill] sm:$0xff] %v3014_v47 }
 0x10b   : > { %v3016_v58 = vpop.f32.mrf.mxu0  ;;  %v3018_v7 = vpop.f32.mrf.mxu1 }
 0x10c   : > { %3242 = vst [vmem:[#allocation2_spill] sm:$0xff] %v3016_v58  ;;  %3243 = vst [vmem:[#allocation5_spill] sm:$0xff] %v3018_v7 }
 0x10d   : > { %v3020_v51 = vpop.f32.mrf.mxu0  ;;  %v3022_v14 = vpop.f32.mrf.mxu1 }
 0x10e   : > { %3244 = vst [vmem:[#allocation3_spill] sm:$0xff] %v3020_v51  ;;  %3245 = vst [vmem:[#allocation8_spill] sm:$0xff] %v3022_v14  ;;  %v931_v51 = vadd.f32 %v2910_v25, %v2914_v28  ;;  %v936_v28 = vadd.f32 %v2922_v36, %v2924_v40  ;;  %v946_v36 = vadd.f32 %v2930_v44, %v2932_v48 }
 0x10f   : > { %v3024_v27 = vpop.f32.mrf.mxu0  ;;  %v3026_v10 = vpop.f32.mrf.mxu1  ;;  %v956_v48 = vadd.f32 %v2938_v52, %v2940_v53  ;;  %v966_v53 = vadd.f32 %v2946_v60, %v2948_v0  ;;  %v976_v0 = vadd.f32 %v2954_v8, %v2956_v9  ;;  %v986_v9 = vadd.f32 %v2962_v20, %v2964_v21 }
 0x110   : > { %3246 = vst [vmem:[#allocation9_spill] sm:$0xff] %v3024_v27  ;;  %3247 = vst [vmem:[#allocation10_spill] sm:$0xff] %v3026_v10  ;;  %v926_v27 = vadd.f32 %v2912_v26, %v2916_v32  ;;  %v996_v21 = vadd.f32 %v2970_v37, %v2972_v38  ;;  %v1006_v38 = vadd.f32 %v2978_v54, %v2980_v56 }
 0x111   : > { %v3028_v11 = vpop.f32.mrf.mxu0  ;;  %v3030_v12 = vpop.f32.mrf.mxu1  ;;  %v1016_v56 = vadd.f32 %v2986_v2, %v2988_v4  ;;  %v1026_v4 = vadd.f32 %v2994_v30, %v2996_v31  ;;  %v1036_v31 = vadd.f32 %v3002_v62, %v3004_v63  ;;  %v3253_v63 = vld [vmem:[#allocation7_spill] sm:$0xff] }
 0x112   : > { %3248 = vst [vmem:[#allocation11_spill] sm:$0xff] %v3028_v11  ;;  %3249 = vst [vmem:[#allocation12_spill] sm:$0xff] %v3030_v12  ;;  %v3046_v12 = vld [vmem:[%s3221_s3] ss:$0 sm:$0xff] }
 0x113   : > { %v3032_v16 = vpop.f32.mrf.mxu0  ;;  %v3034_v23 = vpop.f32.mrf.mxu1 }
 0x114   : > { %3250 = vst [vmem:[#allocation13_spill] sm:$0xff] %v3032_v16  ;;  %3251 = vst [vmem:[#allocation14_spill] sm:$0xff] %v3034_v23 }
 0x115   : > { %v3036_v24 = vpop.f32.mrf.mxu0  ;;  %v2249_v7 = vpop.f32.mrf.mxu1 }
 0x116   : > { %3252 = vst [vmem:[#allocation15_spill] sm:$0xff] %v3036_v24  ;;  %v941_v24 = vadd.f32 %v2918_v33, %v2920_v34 }
 0x117   : > { %v2199_v47 = vpop.f32.mrf.mxu0  ;;  %v1433_v14 = vpop.f32.mrf.mxu1 }
 0x118   : > { %v1321_v10 = vadd.f32 %v2199_v47, %v931_v51 }
 0x119   : > { %v1161_v16 = vpop.f32.mrf.mxu0  ;;  %v2252_v23 = vpop.f32.mrf.mxu1 }
 0x11a   : > { %v1593_v11 = vadd.f32 %v2249_v7, %v1321_v10  ;;  %v1320_v58 = vadd.f32 %v1161_v16, %v926_v27  ;;  %v951_v7 = vadd.f32 %v2926_v41, %v2928_v42  ;;  %v961_v42 = vadd.f32 %v2934_v49, %v2936_v50 }
 0x11b   : > { %v2202_v25 = vpop.f32.mrf.mxu0  ;;  %v1443_v26 = vpop.f32.mrf.mxu1  ;;  %v971_v50 = vadd.f32 %v2942_v55, %v2944_v59  ;;  %v981_v59 = vadd.f32 %v2950_v3, %v2952_v6  ;;  %v991_v6 = vadd.f32 %v2958_v13, %v2960_v15  ;;  %v1001_v15 = vadd.f32 %v2966_v22, %v2968_v29 }
 0x11c   : > { %v1632_v32 = vadd.f32 %v3046_v12, %v1593_v11  ;;  %v1592_v47 = vadd.f32 %v1433_v14, %v1320_v58  ;;  %v1323_v51 = vadd.f32 %v2202_v25, %v941_v24  ;;  %v1011_v29 = vadd.f32 %v2974_v39, %v2976_v45 }
 0x11d   : > { %v1171_v33 = vpop.f32.mrf.mxu0  ;;  %v2255_v34 = vpop.f32.mrf.mxu1  ;;  %v1021_v45 = vadd.f32 %v2982_v57, %v2984_v61  ;;  %v1031_v61 = vadd.f32 %v2990_v5, %v2992_v17  ;;  %v1041_v17 = vadd.f32 %v2998_v35, %v3000_v46  ;;  %v1051_v46 = vadd.f32 %v3006_v1, %v3008_v18  ;;  %v3255_v18 = vld [vmem:[#allocation2_spill] sm:$0xff] }
 0x11e   : > { %1665 = vst.msk [vmem:[%s3053_s14 + $0x8] sm:$0xff] %vm1663_vm3, %v1632_v32  ;;  %v1631_v27 = vadd.f32 %v3046_v12, %v1592_v47  ;;  %v1595_v10 = vadd.f32 %v2252_v23, %v1323_v51  ;;  %v1322_v16 = vadd.f32 %v1171_v33, %v936_v28 }
 0x11f   : > { %v2205_v19 = vpop.f32.mrf.mxu0  ;;  %v1453_v43 = vpop.f32.mrf.mxu1 }
 0x120   : > { %1664 = vst.msk [vmem:[%s3053_s14] sm:$0xff] %vm1663_vm3, %v1631_v27  ;;  %v1634_v40 = vadd.f32 %v3046_v12, %v1595_v10  ;;  %v1594_v58 = vadd.f32 %v1443_v26, %v1322_v16  ;;  %v1325_v14 = vadd.f32 %v2205_v19, %v951_v7 }
 0x121   : > { %v1181_v11 = vpop.f32.mrf.mxu0  ;;  %v2258_v41 = vpop.f32.mrf.mxu1 }
 0x122   : > { %1667 = vst.msk [vmem:[%s3053_s14 + $0x18] sm:$0xff] %vm1663_vm3, %v1634_v40  ;;  %v1633_v23 = vadd.f32 %v3046_v12, %v1594_v58  ;;  %v1597_v24 = vadd.f32 %v2255_v34, %v1325_v14  ;;  %v1324_v25 = vadd.f32 %v1181_v11, %v946_v36 }
 0x123   : > { %v2208_v28 = vpop.f32.mrf.mxu0  ;;  %v1463_v44 = vpop.f32.mrf.mxu1 }
 0x124   : > { %1666 = vst.msk [vmem:[%s3053_s14 + $0x10] sm:$0xff] %vm1663_vm3, %v1633_v23  ;;  %v1636_v19 = vadd.f32 %v3046_v12, %v1597_v24  ;;  %v1596_v26 = vadd.f32 %v1453_v43, %v1324_v25  ;;  %v1327_v32 = vadd.f32 %v2208_v28, %v961_v42 }
 0x125   : > { %v1191_v47 = vpop.f32.mrf.mxu0  ;;  %v2261_v49 = vpop.f32.mrf.mxu1 }
 0x126   : > { %1669 = vst.msk [vmem:[%s3053_s14 + $0x28] sm:$0xff] %vm1663_vm3, %v1636_v19  ;;  %v1635_v51 = vadd.f32 %v3046_v12, %v1596_v26  ;;  %v1599_v33 = vadd.f32 %v2258_v41, %v1327_v32  ;;  %v1326_v34 = vadd.f32 %v1191_v47, %v956_v48 }
 0x127   : > { %v2211_v7 = vpop.f32.mrf.mxu0  ;;  %v1473_v52 = vpop.f32.mrf.mxu1 }
 0x128   : > { %1668 = vst.msk [vmem:[%s3053_s14 + $0x20] sm:$0xff] %vm1663_vm3, %v1635_v51  ;;  %v1638_v43 = vadd.f32 %v3046_v12, %v1599_v33  ;;  %v1598_v27 = vadd.f32 %v1463_v44, %v1326_v34  ;;  %v1329_v10 = vadd.f32 %v2211_v7, %v971_v50 }
 0x129   : > { %v1201_v16 = vpop.f32.mrf.mxu0  ;;  %v2264_v55 = vpop.f32.mrf.mxu1 }
 0x12a   : > { %1671 = vst.msk [vmem:[%s3053_s14 + $0x38] sm:$0xff] %vm1663_vm3, %v1638_v43  ;;  %v1637_v36 = vadd.f32 %v3046_v12, %v1598_v27  ;;  %v1601_v40 = vadd.f32 %v2261_v49, %v1329_v10  ;;  %v1328_v58 = vadd.f32 %v1201_v16, %v966_v53 }
 0x12b   : > { %v2214_v14 = vpop.f32.mrf.mxu0  ;;  %v1483_v60 = vpop.f32.mrf.mxu1 }
 0x12c   : > { %1670 = vst.msk [vmem:[%s3053_s14 + $0x30] sm:$0xff] %vm1663_vm3, %v1637_v36  ;;  %v1640_v11 = vadd.f32 %v3046_v12, %v1601_v40  ;;  %v1600_v41 = vadd.f32 %v1473_v52, %v1328_v58  ;;  %v1331_v42 = vadd.f32 %v2214_v14, %v981_v59 }
 0x12d   : > { %v1211_v23 = vpop.f32.mrf.mxu0  ;;  %v2267_v3 = vpop.f32.mrf.mxu1 }
 0x12e   : > { %1673 = vst.msk [vmem:[%s3053_s14 + $0x48] sm:$0xff] %vm1663_vm3, %v1640_v11  ;;  %v1639_v24 = vadd.f32 %v3046_v12, %v1600_v41  ;;  %v1603_v25 = vadd.f32 %v2264_v55, %v1331_v42  ;;  %v1330_v28 = vadd.f32 %v1211_v23, %v976_v0 }
 0x12f   : > { %v2217_v44 = vpop.f32.mrf.mxu0  ;;  %v1493_v8 = vpop.f32.mrf.mxu1 }
 0x130   : > { %1672 = vst.msk [vmem:[%s3053_s14 + $0x40] sm:$0xff] %vm1663_vm3, %v1639_v24  ;;  %v1642_v48 = vadd.f32 %v3046_v12, %v1603_v25  ;;  %v1602_v19 = vadd.f32 %v1483_v60, %v1330_v28  ;;  %v1333_v26 = vadd.f32 %v2217_v44, %v991_v6 }
 0x131   : > { %v1221_v32 = vpop.f32.mrf.mxu0  ;;  %v2270_v13 = vpop.f32.mrf.mxu1 }
 0x132   : > { %1675 = vst.msk [vmem:[%s3053_s14 + $0x58] sm:$0xff] %vm1663_vm3, %v1642_v48  ;;  %v1641_v47 = vadd.f32 %v3046_v12, %v1602_v19  ;;  %v1605_v49 = vadd.f32 %v2267_v3, %v1333_v26  ;;  %v1332_v50 = vadd.f32 %v1221_v32, %v986_v9 }
 0x133   : > { %v2220_v51 = vpop.f32.mrf.mxu0  ;;  %v1503_v20 = vpop.f32.mrf.mxu1 }
 0x134   : > { %1674 = vst.msk [vmem:[%s3053_s14 + $0x50] sm:$0xff] %vm1663_vm3, %v1641_v47  ;;  %v1644_v33 = vadd.f32 %v3046_v12, %v1605_v49  ;;  %v1604_v34 = vadd.f32 %v1493_v8, %v1332_v50  ;;  %v1335_v7 = vadd.f32 %v2220_v51, %v1001_v15 }
 0x135   : > { %v1231_v52 = vpop.f32.mrf.mxu0  ;;  %v2273_v22 = vpop.f32.mrf.mxu1 }
 0x136   : > { %1677 = vst.msk [vmem:[%s3053_s14 + $0x68] sm:$0xff] %vm1663_vm3, %v1644_v33  ;;  %v1643_v53 = vadd.f32 %v3046_v12, %v1604_v34  ;;  %v1607_v43 = vadd.f32 %v2270_v13, %v1335_v7  ;;  %v1334_v27 = vadd.f32 %v1231_v52, %v996_v21  ;;  %v3254_v21 = vld [vmem:[#allocation6_spill] sm:$0xff] }
 0x137   : > { %v2223_v10 = vpop.f32.mrf.mxu0  ;;  %v1513_v37 = vpop.f32.mrf.mxu1  ;;  %v1046_v33 = vadd.f32 %v3254_v21, %v3253_v63 }
 0x138   : > { %1676 = vst.msk [vmem:[%s3053_s14 + $0x60] sm:$0xff] %vm1663_vm3, %v1643_v53  ;;  %v1646_v16 = vadd.f32 %v3046_v12, %v1607_v43  ;;  %v1606_v55 = vadd.f32 %v1503_v20, %v1334_v27  ;;  %v1337_v59 = vadd.f32 %v2223_v10, %v1011_v29  ;;  %v3256_v29 = vld [vmem:[#allocation4_spill] sm:$0xff] }
 0x139   : > { %v1241_v36 = vpop.f32.mrf.mxu0  ;;  %v2276_v39 = vpop.f32.mrf.mxu1  ;;  %v1061_v53 = vadd.f32 %v3256_v29, %v3255_v18 }
 0x13a   : > { %1679 = vst.msk [vmem:[%s3053_s14 + $0x78] sm:$0xff] %vm1663_vm3, %v1646_v16  ;;  %v1645_v40 = vadd.f32 %v3046_v12, %v1606_v55  ;;  %v1609_v58 = vadd.f32 %v2273_v22, %v1337_v59  ;;  %v1336_v14 = vadd.f32 %v1241_v36, %v1006_v38  ;;  %v3257_v16 = vld [vmem:[#allocation3_spill] sm:$0xff]  ;;  %v3258_v55 = vld [vmem:[#allocation5_spill] sm:$0xff] }
 0x13b   : > { %v2226_v60 = vpop.f32.mrf.mxu0  ;;  %v1523_v54 = vpop.f32.mrf.mxu1  ;;  %v1056_v59 = vadd.f32 %v3258_v55, %v3257_v16 }
 0x13c   : > { %1678 = vst.msk [vmem:[%s3053_s14 + $0x70] sm:$0xff] %vm1663_vm3, %v1645_v40  ;;  %v1648_v0 = vadd.f32 %v3046_v12, %v1609_v58  ;;  %v1608_v11 = vadd.f32 %v1513_v37, %v1336_v14  ;;  %v1339_v41 = vadd.f32 %v2226_v60, %v1021_v45  ;;  %v3259_v14 = vld [vmem:[#allocation9_spill] sm:$0xff]  ;;  %v3260_v60 = vld [vmem:[#allocation8_spill] sm:$0xff] }
 0x13d   : > { %v1251_v42 = vpop.f32.mrf.mxu0  ;;  %v2279_v57 = vpop.f32.mrf.mxu1 }
 0x13e   : > { %1681 = vst.msk [vmem:[%s3053_s14 + $0x88] sm:$0xff] %vm1663_vm3, %v1648_v0  ;;  %v1647_v23 = vadd.f32 %v3046_v12, %v1608_v11  ;;  %v1611_v3 = vadd.f32 %v2276_v39, %v1339_v41  ;;  %v1338_v6 = vadd.f32 %v1251_v42, %v1016_v56 }
 0x13f   : > { %v2229_v24 = vpop.f32.mrf.mxu0  ;;  %v1533_v2 = vpop.f32.mrf.mxu1 }
 0x140   : > { %1680 = vst.msk [vmem:[%s3053_s14 + $0x80] sm:$0xff] %vm1663_vm3, %v1647_v23  ;;  %v1650_v25 = vadd.f32 %v3046_v12, %v1611_v3  ;;  %v1610_v28 = vadd.f32 %v1523_v54, %v1338_v6  ;;  %v1341_v44 = vadd.f32 %v2229_v24, %v1031_v61  ;;  %v1071_v54 = vadd.f32 %v3260_v60, %v3259_v14  ;;  %v3262_v61 = vld [vmem:[#allocation10_spill] sm:$0xff] }
 0x141   : > { %v1261_v8 = vpop.f32.mrf.mxu0  ;;  %v2282_v5 = vpop.f32.mrf.mxu1 }
 0x142   : > { %1683 = vst.msk [vmem:[%s3053_s14 + $0x98] sm:$0xff] %vm1663_vm3, %v1650_v25  ;;  %v1649_v9 = vadd.f32 %v3046_v12, %v1610_v28  ;;  %v1613_v48 = vadd.f32 %v2279_v57, %v1341_v44  ;;  %v1340_v19 = vadd.f32 %v1261_v8, %v1026_v4  ;;  %v3261_v57 = vld [vmem:[#allocation11_spill] sm:$0xff]  ;;  %v3263_v4 = vld [vmem:[#allocation13_spill] sm:$0xff]  ;;  %v3264_v25 = vld [vmem:[#allocation12_spill] sm:$0xff] }
 0x143   : > { %v2232_v26 = vpop.f32.mrf.mxu0  ;;  %v1543_v30 = vpop.f32.mrf.mxu1  ;;  %v1066_v23 = vadd.f32 %v3262_v61, %v3261_v57  ;;  %v1081_v28 = vadd.f32 %v3264_v25, %v3263_v4 }
 0x144   : > { %1682 = vst.msk [vmem:[%s3053_s14 + $0x90] sm:$0xff] %vm1663_vm3, %v1649_v9  ;;  %v1652_v32 = vadd.f32 %v3046_v12, %v1613_v48  ;;  %v1612_v13 = vadd.f32 %v1533_v2, %v1340_v19  ;;  %v1343_v15 = vadd.f32 %v2232_v26, %v1041_v17  ;;  %v3265_v48 = vld [vmem:[#allocation15_spill] sm:$0xff]  ;;  %v3266_v19 = vld [vmem:[#allocation14_spill] sm:$0xff] }
 0x145   : > { %v1271_v47 = vpop.f32.mrf.mxu0  ;;  %v2285_v35 = vpop.f32.mrf.mxu1  ;;  %v1076_v26 = vadd.f32 %v3266_v19, %v3265_v48 }
 0x146   : > { %1685 = vst.msk [vmem:[%s3053_s14 + $0xa8] sm:$0xff] %vm1663_vm3, %v1652_v32  ;;  %v1651_v49 = vadd.f32 %v3046_v12, %v1612_v13  ;;  %v1615_v50 = vadd.f32 %v2282_v5, %v1343_v15  ;;  %v1342_v51 = vadd.f32 %v1271_v47, %v1036_v31 }
 0x147   : > { %v2235_v20 = vpop.f32.mrf.mxu0  ;;  %v1553_v62 = vpop.f32.mrf.mxu1 }
 0x148   : > { %1684 = vst.msk [vmem:[%s3053_s14 + $0xa0] sm:$0xff] %vm1663_vm3, %v1651_v49  ;;  %v1654_v34 = vadd.f32 %v3046_v12, %v1615_v50  ;;  %v1614_v7 = vadd.f32 %v1543_v30, %v1342_v51  ;;  %v1345_v52 = vadd.f32 %v2235_v20, %v1051_v46 }
 0x149   : > { %v1281_v22 = vpop.f32.mrf.mxu0  ;;  %v2288_v1 = vpop.f32.mrf.mxu1 }
 0x14a   : > { %1687 = vst.msk [vmem:[%s3053_s14 + $0xb8] sm:$0xff] %vm1663_vm3, %v1654_v34  ;;  %v1653_v43 = vadd.f32 %v3046_v12, %v1614_v7  ;;  %v1617_v27 = vadd.f32 %v2285_v35, %v1345_v52  ;;  %v1344_v10 = vadd.f32 %v1281_v22, %v1046_v33 }
 0x14b   : > { %v2238_v37 = vpop.f32.mrf.mxu0  ;;  %v1563_v38 = vpop.f32.mrf.mxu1 }
 0x14c   : > { %1686 = vst.msk [vmem:[%s3053_s14 + $0xb0] sm:$0xff] %vm1663_vm3, %v1653_v43  ;;  %v1656_v36 = vadd.f32 %v3046_v12, %v1617_v27  ;;  %v1616_v39 = vadd.f32 %v1553_v62, %v1344_v10  ;;  %v1347_v45 = vadd.f32 %v2238_v37, %v1061_v53 }
 0x14d   : > { %v1291_v40 = vpop.f32.mrf.mxu0  ;;  %v2291_v58 = vpop.f32.mrf.mxu1 }
 0x14e   : > { %1689 = vst.msk [vmem:[%s3053_s14 + $0xc8] sm:$0xff] %vm1663_vm3, %v1656_v36  ;;  %v1655_v56 = vadd.f32 %v3046_v12, %v1616_v39  ;;  %v1619_v0 = vadd.f32 %v2288_v1, %v1347_v45  ;;  %v1346_v11 = vadd.f32 %v1291_v40, %v1056_v59 }
 0x14f   : > { %v2241_v41 = vpop.f32.mrf.mxu0  ;;  %v1573_v42 = vpop.f32.mrf.mxu1 }
 0x150   : > { %1688 = vst.msk [vmem:[%s3053_s14 + $0xc0] sm:$0xff] %vm1663_vm3, %v1655_v56  ;;  %v1658_v3 = vadd.f32 %v3046_v12, %v1619_v0  ;;  %v1618_v6 = vadd.f32 %v1563_v38, %v1346_v11  ;;  %v1349_v24 = vadd.f32 %v2241_v41, %v1071_v54 }
 0x151   : > { %v1301_v2 = vpop.f32.mrf.mxu0  ;;  %v2294_v9 = vpop.f32.mrf.mxu1 }
 0x152   : > { %1691 = vst.msk [vmem:[%s3053_s14 + $0xd8] sm:$0xff] %vm1663_vm3, %v1658_v3  ;;  %v1657_v44 = vadd.f32 %v3046_v12, %v1618_v6  ;;  %v1621_v8 = vadd.f32 %v2291_v58, %v1349_v24  ;;  %v1348_v5 = vadd.f32 %v1301_v2, %v1066_v23 }
 0x153   : > { %v2244_v17 = vpop.f32.mrf.mxu0  ;;  %v1583_v46 = vpop.f32.mrf.mxu1 }
 0x154   : > { %1690 = vst.msk [vmem:[%s3053_s14 + $0xd0] sm:$0xff] %vm1663_vm3, %v1657_v44  ;;  %v1660_v30 = vadd.f32 %v3046_v12, %v1621_v8  ;;  %v1620_v31 = vadd.f32 %v1573_v42, %v1348_v5  ;;  %v1351_v32 = vadd.f32 %v2244_v17, %v1081_v28 }
 0x155   : > { %v1311_v13 = vpop.f32.mrf.mxu0 }
 0x156   : > { %1693 = vst.msk [vmem:[%s3053_s14 + $0xe8] sm:$0xff] %vm1663_vm3, %v1660_v30  ;;  %v1659_v15 = vadd.f32 %v3046_v12, %v1620_v31  ;;  %v1623_v47 = vadd.f32 %v2294_v9, %v1351_v32  ;;  %v1350_v35 = vadd.f32 %v1311_v13, %v1076_v26 }
 0x158   : > { %1692 = vst.msk [vmem:[%s3053_s14 + $0xe0] sm:$0xff] %vm1663_vm3, %v1659_v15  ;;  %v1662_v49 = vadd.f32 %v3046_v12, %v1623_v47  ;;  %v1622_v50 = vadd.f32 %v1583_v46, %v1350_v35 }
 0x15a   : > { %1695 = vst.msk [vmem:[%s3053_s14 + $0xf8] sm:$0xff] %vm1663_vm3, %v1662_v49  ;;  %v1661_v51 = vadd.f32 %v3046_v12, %v1622_v50 }
 0x15c   : > { %1694 = vst.msk [vmem:[%s3053_s14 + $0xf0] sm:$0xff] %vm1663_vm3, %v1661_v51 }
 0x15d PF: > { %s14_s17 = sadd.s32 1, %s2344_s17   ;;  %s3267_s15 = smov %s2340_s16 }
 0x15e   : > { %p11_p5 = scmp.ge.s32.totalorder %s14_s17, 4   ;;  %s3268_s16 = smov %s3270_s18 }
 0x160   :  { %13 = sbr.rel (!%p11_p5) target bundleno = 2 (0x2), region = 72 }

</bundles_post_ra>
